<compile_context>
chip_gen: v5e
topology: v5e:2x2
jax: 0.10.0
libtpu: 0.0.40
codegen_flags: <defaults>
</compile_context>

<pallas_src>
import functools

import jax
import jax.numpy as jnp
from jax.experimental import pallas as pl
from jax.experimental.pallas import tpu as pltpu


def _round_up(x, m):
    return ((x + m - 1) // m) * m


# ---------------------------------------------------------------------------
# Kernels
# ---------------------------------------------------------------------------
def _charcnn_band_kernel(x_ref, w_ref, b_ref, o_ref):
    # x_ref: (tn, L*C); w_ref: (L*C, H*L) cols ordered h*L+l; b_ref: (1, H*L)
    y = jnp.dot(x_ref[...], w_ref[...], preferred_element_type=jnp.float32)
    o_ref[...] = (y + b_ref[...].astype(jnp.float32)).astype(o_ref.dtype)


def _charcnn_band_pool_kernel(x_ref, w_ref, b_ref, o_ref, *, L, H):
    # x_ref: (tn, L*C); w_ref: (L*C, L*H) cols ordered l*H+h; b_ref: (1, H)
    y = jnp.dot(x_ref[...], w_ref[...], preferred_element_type=jnp.float32)  # (tn, L*H)
    # Fused max-pool over L: running max over L contiguous H-wide lane slices.
    pooled = y[:, 0:H]
    for l in range(1, L):
        pooled = jnp.maximum(pooled, y[:, l * H:(l + 1) * H])
    o_ref[...] = (pooled + b_ref[...].astype(jnp.float32)).astype(o_ref.dtype)


# ---------------------------------------------------------------------------
# Banded-weight construction (trace-time, wrapper side)
# ---------------------------------------------------------------------------
def _build_band_weight(weight, L, order):
    """weight: (H, C, 3) PyTorch Conv1d weight -> (L*C, L*H) banded matrix.

    order == "hl": column index = h*L + l  (PyTorch feature flatten order)
    order == "lh": column index = l*H + h  (used by the fused max-pool kernel)
    """
    H, C, K = weight.shape
    lp = jnp.arange(L)[:, None]          # source char position (row blocks)
    l = jnp.arange(L)[None, :]           # output char position
    t = lp - l + 1                       # conv tap index for padding=1
    valid = (t >= 0) & (t < K)
    tc = jnp.clip(t, 0, K - 1)
    g = weight[:, :, tc]                 # (H, C, Lp, Ll) = weight[h, c, t[lp, l]]
    g = jnp.where(valid[None, None, :, :], g, jnp.zeros_like(g))
    if order == "hl":
        band = jnp.transpose(g, (2, 1, 0, 3))   # (Lp, C, H, Ll)
    else:
        band = jnp.transpose(g, (2, 1, 3, 0))   # (Lp, C, Ll, H)
    return band.reshape(L * C, L * H)


# ---------------------------------------------------------------------------
# Wrapper
# ---------------------------------------------------------------------------
def char_cnn_forward(char_embeddings, weight, bias, max_pool=False, block_n=1024):
    """CharCNN forward (eval mode).

    char_embeddings: (B, T, L, C); weight: (H, C, 3) PyTorch Conv1d layout; bias: (H,).
    Returns (B, T, H*L) if max_pool=False (feature order h*L + l), else (B, T, H).
    """
    # TODO(synk): nn.Dropout is identity at inference; training-mode dropout not applied.
    B, T, L, C = char_embeddings.shape
    H = weight.shape[0]
    N = B * T
    dtype = char_embeddings.dtype

    x = char_embeddings.reshape(N, L * C)

    # Row tile: large, multiple of 8, remainder handled by zero padding.
    tn = min(_round_up(block_n, 8), _round_up(N, 8))
    n_pad = _round_up(N, tn)
    if n_pad != N:
        x = jnp.pad(x, ((0, n_pad - N), (0, 0)))
    grid = n_pad // tn

    if max_pool:
        out_cols = H
        w_band = _build_band_weight(weight, L, order="lh").astype(dtype)
        b_arg = bias.reshape(1, H)
        kernel = functools.partial(_charcnn_band_pool_kernel, L=L, H=H)
    else:
        out_cols = H * L
        w_band = _build_band_weight(weight, L, order="hl").astype(dtype)
        b_arg = jnp.repeat(bias, L).reshape(1, H * L)   # b_band[h*L + l] = bias[h]
        kernel = _charcnn_band_kernel

    # VMEM budget: double-buffered x/out blocks + resident W_band/bias + f32 temp.
    need = (2 * tn * (L * C + out_cols) * 4
            + (L * C) * (H * L) * 4
            + tn * (H * L) * 4
            + (1 << 20))
    vmem_limit = int(min(max(need, 16 << 20), 48 << 20))

    out = pl.pallas_call(
        kernel,
        out_shape=jax.ShapeDtypeStruct((n_pad, out_cols), dtype),
        grid_spec=pltpu.PrefetchScalarGridSpec(
            num_scalar_prefetch=0,
            grid=(grid,),
            in_specs=[
                pl.BlockSpec((tn, L * C), lambda i: (i, 0)),
                pl.BlockSpec((L * C, L * H), lambda i: (0, 0)),   # VMEM-resident weights
                pl.BlockSpec((1, out_cols), lambda i: (0, 0)),    # VMEM-resident bias
            ],
            out_specs=pl.BlockSpec((tn, out_cols), lambda i: (i, 0)),
        ),
        compiler_params=pltpu.CompilerParams(
            dimension_semantics=("parallel",),
            vmem_limit_bytes=vmem_limit,
        ),
    )(x, w_band, b_arg)

    out = out[:N]
    if max_pool:
        return out.reshape(B, T, H)
    return out.reshape(B, T, H * L)


# ---------------------------------------------------------------------------
# Pure-JAX reference mirroring the PyTorch forward (eval mode)
# ---------------------------------------------------------------------------
def char_cnn_reference(char_embeddings, weight, bias, max_pool=False):
    B, T, L, C = char_embeddings.shape
    H = weight.shape[0]
    x = char_embeddings.reshape(B * T, L, C)
    xp = jnp.pad(x, ((0, 0), (1, 1), (0, 0)))
    y = jnp.zeros((B * T, L, H), jnp.float32)
    for t in range(3):
        y = y + jnp.einsum('nlc,hc->nlh', xp[:, t:t + L, :].astype(jnp.float32),
                           weight[:, :, t].astype(jnp.float32))
    y = y + bias[None, None, :]
    if max_pool:
        return jnp.max(y, axis=1).reshape(B, T, H)
    return jnp.transpose(y, (0, 2, 1)).reshape(B, T, H * L)


if __name__ == "__main__":
    # (batch, max_len, max_char_len, char_embed_dim), hidden_dim
    B, T, L, C, H = 2, 8, 16, 8, 32

    key = jax.random.PRNGKey(0)
    k_x, k_w, k_b = jax.random.split(key, 3)
    char_embeddings = jax.random.normal(k_x, (B, T, L, C), dtype=jnp.float32)
    weight = 0.1 * jax.random.normal(k_w, (H, C, 3), dtype=jnp.float32)  # Conv1d weight
    bias = 0.1 * jax.random.normal(k_b, (H,), dtype=jnp.float32)

    # Non-pooled path (single grid step at this size).
    out = jax.block_until_ready(
        char_cnn_forward(char_embeddings, weight, bias, max_pool=False))
    assert out.shape == (B, T, H * L), out.shape
    ref = char_cnn_reference(char_embeddings, weight, bias, max_pool=False)
    assert jnp.allclose(out, ref, atol=1e-4, rtol=1e-4), "mismatch (conv path)"

    # Fused max-pool path.
    out_mp = jax.block_until_ready(
        char_cnn_forward(char_embeddings, weight, bias, max_pool=True))
    ref_mp = char_cnn_reference(char_embeddings, weight, bias, max_pool=True)
    assert out_mp.shape == (B, T, H)
    assert jnp.allclose(out_mp, ref_mp, atol=1e-4, rtol=1e-4), "mismatch (max_pool path)"

    # Multi-step grid (grid=2 with tn=8).
    out_g = jax.block_until_ready(
        char_cnn_forward(char_embeddings, weight, bias, max_pool=False, block_n=8))
    assert jnp.allclose(out_g, ref, atol=1e-4, rtol=1e-4), "mismatch (multi-step grid)"

    # N = B*T not a multiple of the tile -> exercises the zero-padding remainder path.
    B2, T2 = 3, 5
    ce2 = jax.random.normal(jax.random.PRNGKey(1), (B2, T2, L, C), dtype=jnp.float32)
    out2 = jax.block_until_ready(char_cnn_forward(ce2, weight, bias, max_pool=False))
    ref2 = char_cnn_reference(ce2, weight, bias, max_pool=False)
    assert jnp.allclose(out2, ref2, atol=1e-4, rtol=1e-4), "mismatch (padded N)"

    print("KERNEL_OK")
</pallas_src>

<mosaic_0001>
module attributes {stable_mosaic.version = 11 : i64} {
  func.func @_charcnn_band_kernel(%arg0: i32, %arg1: memref<16x128xf32, #tpu.memory_space<vmem>>, %arg2: memref<128x512xf32, #tpu.memory_space<vmem>>, %arg3: memref<1x512xf32, #tpu.memory_space<vmem>>, %arg4: memref<16x512xf32, #tpu.memory_space<vmem>>) attributes {dimension_semantics = [#tpu.dimension_semantics<parallel>], iteration_bounds = array<i64: 1>, scalar_prefetch = 0 : i64, scratch_operands = 0 : i64, tpu.core_type = #tpu.core_type<tc>, window_params = [{transform_indices = @transform_0, window_bounds = array<i64: 16, 128>}, {pipeline_mode = #tpu.pipeline_mode<synchronous>, transform_indices = @transform_1, window_bounds = array<i64: 128, 512>}, {pipeline_mode = #tpu.pipeline_mode<synchronous>, transform_indices = @transform_2, window_bounds = array<i64: 1, 512>}, {transform_indices = @transform_3, window_bounds = array<i64: 16, 512>}]} {
    %c0 = arith.constant 0 : index
    %c0_0 = arith.constant 0 : index
    %0 = vector.load %arg1[%c0, %c0_0] : memref<16x128xf32, #tpu.memory_space<vmem>>, vector<16x128xf32>
    %c0_1 = arith.constant 0 : index
    %c0_2 = arith.constant 0 : index
    %1 = vector.load %arg2[%c0_1, %c0_2] : memref<128x512xf32, #tpu.memory_space<vmem>>, vector<128x512xf32>
    %cst = arith.constant dense<0.000000e+00> : vector<16x512xf32>
    %2 = tpu.matmul %0, %1, %cst {dimension_numbers = #tpu.dot_dimension_numbers<[1], [0], [0], [1], [0, 0, 1, 1], [], []>} : vector<16x128xf32>, vector<128x512xf32>, vector<16x512xf32> -> vector<16x512xf32>
    %c0_3 = arith.constant 0 : index
    %c0_4 = arith.constant 0 : index
    %3 = vector.load %arg3[%c0_3, %c0_4] : memref<1x512xf32, #tpu.memory_space<vmem>>, vector<1x512xf32>
    %4 = vector.broadcast %3 : vector<1x512xf32> to vector<16x512xf32>
    %5 = arith.addf %2, %4 : vector<16x512xf32>
    %c0_5 = arith.constant 0 : index
    %c0_6 = arith.constant 0 : index
    %6 = vector.load %arg4[%c0_5, %c0_6] : memref<16x512xf32, #tpu.memory_space<vmem>>, vector<16x512xf32>
    tpu.vector_store %arg4[%c0_5, %c0_6], %5 {strides = array<i32>} : memref<16x512xf32, #tpu.memory_space<vmem>>, vector<16x512xf32>,
    return
  }
  func.func @transform_0(%arg0: i32) -> (i32, i32) {
    %c0_i32 = arith.constant 0 : i32
    %c0_i32_0 = arith.constant 0 : i32
    return %arg0, %c0_i32 : i32, i32
  }
  func.func @transform_1(%arg0: i32) -> (i32, i32) {
    %c0_i32 = arith.constant 0 : i32
    %c0_i32_0 = arith.constant 0 : i32
    %c0_i32_1 = arith.constant 0 : i32
    return %c0_i32, %c0_i32_0 : i32, i32
  }
  func.func @transform_2(%arg0: i32) -> (i32, i32) {
    %c0_i32 = arith.constant 0 : i32
    %c0_i32_0 = arith.constant 0 : i32
    %c0_i32_1 = arith.constant 0 : i32
    return %c0_i32, %c0_i32_0 : i32, i32
  }
  func.func @transform_3(%arg0: i32) -> (i32, i32) {
    %c0_i32 = arith.constant 0 : i32
    %c0_i32_0 = arith.constant 0 : i32
    return %arg0, %c0_i32 : i32, i32
  }
}

</mosaic_0001>

<bundles_post_ra>
// kernel: tpu_custom_call.1
= control target key start
LH: loop header
LB: loop body
LE: loop exit
PB: predicated region body
PF: predicated region fallthrough
CT: control target
= control target key end

     0   :  { %8 = vsyncpa [#allocation3], 0  ;;  %s412_s0 = inlined_call_operand.hbm [shape: f32[16,128], index: 0, kind: input, shape index: {}]   ;;  %s413_s1 = inlined_call_operand.hbm [shape: f32[128,512], index: 1, kind: input, shape index: {}]   ;;  %s414_s2 = inlined_call_operand.hbm [shape: f32[1,512], index: 2, kind: input, shape index: {}]   ;;  %s415_s3 = inlined_call_operand.hbm [shape: f32[16,512], index: 3, kind: output, shape index: {}]  }
   0x1   :  { %9 = vsyncpa [#allocation6], 0  ;;  %s28_s14 = sshll.u32 %s413_s1, 4  ;;  %s29_s14 = int_to_ptr.hbm [resolvable:$true] %s28_s14 }
   0x2   :  { %10 = vsyncpa [#allocation4], 0  ;;  %s366_s15 = smov [#allocation5]   ;;  %s15_s19 = sshll.u32 %s412_s0, 4  ;;  %s16_s19 = int_to_ptr.hbm [resolvable:$true] %s15_s19 }
   0x3   :  { %s30_s16 = sshll.u32 %s366_s15, 4  ;;  %s367_s20 = smov 512   ;;  %s31_s16 = int_to_ptr.vmem [resolvable:$true] %s30_s16 }
   0x4   :  { %s368_s21 = smov 32   ;;  %s369_s22 = smov [#allocation2]  }
   0x5   :  { %36 = dma.hbm_to_vmem [thread:$0]  %s29_s14, 8192, %s31_s16, [#allocation6], %s367_s20, %s367_s20, %s368_s21  }
   0x6   :  { %s17_s23 = sshll.u32 %s369_s22, 4  ;;  %s370_s1 = smov 128   ;;  %s18_s23 = int_to_ptr.vmem [resolvable:$true] %s17_s23 }
   0x7   :  { %s371_s24 = smov 8   ;;  %s42_s27 = sshll.u32 %s414_s2, 4  ;;  %s43_s27 = int_to_ptr.hbm [resolvable:$true] %s42_s27 }
   0x8   :  { %23 = dma.hbm_to_vmem [thread:$0]  %s16_s19, 256, %s18_s23, [#allocation3], %s370_s1, %s370_s1, %s371_s24  }
   0x9   :  { %s372_s28 = smov [#allocation7]  }
   0xa   :  { %s44_s0 = sshll.u32 %s372_s28, 4  ;;  %s45_s0 = int_to_ptr.vmem [resolvable:$true] %s44_s0 }
   0xb   :  { %47 = dma.hbm_to_vmem [thread:$0]  %s43_s27, 64, %s45_s0, [#allocation6]  }
   0xc   :  { %360 = dma.done.wait [#allocation3], 256  }
   0xd   :  { %361 = vsyncadd [#allocation3], 4294967040 }
   0xe   :  { %362 = dma.done.wait [#allocation6], 8256  }
   0xf   :  { %363 = vsyncadd [#allocation6], 4294959040  ;;  %v124_v0 = vld [vmem:[#allocation5 + $0x1f0] sm:$0xff]  ;;  %v125_v1 = vld [vmem:[#allocation5 + $0x1f8] sm:$0xff]  ;;  %s373_s2 = smov [#allocation8]   ;;  %s242_s5 = sshll.u32 %s415_s3, 4  ;;  %s243_s5 = int_to_ptr.hbm [resolvable:$true] %s242_s5 }
  0x10   :  { %v120_v2 = vld [vmem:[#allocation5 + $0x1d0] sm:$0xff]  ;;  %182 = vmatpush.msra.mxu2 %v124_v0  ;;  %205 = vmatpush.msra.mxu3 %v125_v1  ;;  %v121_v3 = vld [vmem:[#allocation5 + $0x1d8] sm:$0xff]  ;;  %v122_v6 = vld [vmem:[#allocation5 + $0x1e0] sm:$0xff]  ;;  %s240_s29 = sshll.u32 %s373_s2, 4  ;;  %s241_s29 = int_to_ptr.vmem [resolvable:$true] %s240_s29 }
  0x11   :  { %v116_v4 = vld [vmem:[#allocation5 + $0x1b0] sm:$0xff]  ;;  %v117_v5 = vld [vmem:[#allocation5 + $0x1b8] sm:$0xff]  ;;  %v123_v7 = vld [vmem:[#allocation5 + $0x1e8] sm:$0xff]  ;;  %136 = vmatpush.msra.mxu0 %v122_v6 }
  0x12   :  { %183 = vmatpush.msra.mxu2 %v120_v2  ;;  %206 = vmatpush.msra.mxu3 %v121_v3  ;;  %v118_v8 = vld [vmem:[#allocation5 + $0x1c0] sm:$0xff]  ;;  %v119_v9 = vld [vmem:[#allocation5 + $0x1c8] sm:$0xff]  ;;  %v112_v10 = vld [vmem:[#allocation5 + $0x190] sm:$0xff] }
  0x13   :  { %159 = vmatpush.msra.mxu1 %v123_v7  ;;  %v113_v11 = vld [vmem:[#allocation5 + $0x198] sm:$0xff]  ;;  %v114_v12 = vld [vmem:[#allocation5 + $0x1a0] sm:$0xff]  ;;  %v115_v13 = vld [vmem:[#allocation5 + $0x1a8] sm:$0xff]  ;;  %137 = vmatpush.msra.mxu0 %v118_v8 }
  0x14   :  { %184 = vmatpush.msra.mxu2 %v116_v4  ;;  %207 = vmatpush.msra.mxu3 %v117_v5  ;;  %v108_v14 = vld [vmem:[#allocation5 + $0x170] sm:$0xff]  ;;  %v109_v15 = vld [vmem:[#allocation5 + $0x178] sm:$0xff]  ;;  %v110_v16 = vld [vmem:[#allocation5 + $0x180] sm:$0xff] }
  0x15   :  { %160 = vmatpush.msra.mxu1 %v119_v9  ;;  %v111_v17 = vld [vmem:[#allocation5 + $0x188] sm:$0xff]  ;;  %138 = vmatpush.msra.mxu0 %v114_v12  ;;  %v104_v18 = vld [vmem:[#allocation5 + $0x150] sm:$0xff]  ;;  %v105_v19 = vld [vmem:[#allocation5 + $0x158] sm:$0xff] }
  0x16   :  { %185 = vmatpush.msra.mxu2 %v112_v10  ;;  %208 = vmatpush.msra.mxu3 %v113_v11  ;;  %v106_v20 = vld [vmem:[#allocation5 + $0x160] sm:$0xff]  ;;  %v107_v21 = vld [vmem:[#allocation5 + $0x168] sm:$0xff]  ;;  %v100_v22 = vld [vmem:[#allocation5 + $0x130] sm:$0xff] }
  0x17   :  { %161 = vmatpush.msra.mxu1 %v115_v13  ;;  %139 = vmatpush.msra.mxu0 %v110_v16  ;;  %v101_v23 = vld [vmem:[#allocation5 + $0x138] sm:$0xff]  ;;  %v102_v24 = vld [vmem:[#allocation5 + $0x140] sm:$0xff]  ;;  %v103_v25 = vld [vmem:[#allocation5 + $0x148] sm:$0xff] }
  0x18   :  { %186 = vmatpush.msra.mxu2 %v108_v14  ;;  %209 = vmatpush.msra.mxu3 %v109_v15  ;;  %v96_v26 = vld [vmem:[#allocation5 + $0x110] sm:$0xff]  ;;  %v97_v27 = vld [vmem:[#allocation5 + $0x118] sm:$0xff]  ;;  %v98_v28 = vld [vmem:[#allocation5 + $0x120] sm:$0xff] }
  0x19   :  { %162 = vmatpush.msra.mxu1 %v111_v17  ;;  %140 = vmatpush.msra.mxu0 %v106_v20  ;;  %v99_v29 = vld [vmem:[#allocation5 + $0x128] sm:$0xff]  ;;  %v92_v30 = vld [vmem:[#allocation5 + $0xf0] sm:$0xff]  ;;  %v93_v31 = vld [vmem:[#allocation5 + $0xf8] sm:$0xff] }
  0x1a   :  { %187 = vmatpush.msra.mxu2 %v104_v18  ;;  %210 = vmatpush.msra.mxu3 %v105_v19  ;;  %v94_v32 = vld [vmem:[#allocation5 + $0x100] sm:$0xff]  ;;  %v95_v33 = vld [vmem:[#allocation5 + $0x108] sm:$0xff]  ;;  %v88_v34 = vld [vmem:[#allocation5 + $0xd0] sm:$0xff] }
  0x1b   :  { %163 = vmatpush.msra.mxu1 %v107_v21  ;;  %141 = vmatpush.msra.mxu0 %v102_v24  ;;  %v89_v35 = vld [vmem:[#allocation5 + $0xd8] sm:$0xff]  ;;  %v90_v36 = vld [vmem:[#allocation5 + $0xe0] sm:$0xff]  ;;  %v91_v37 = vld [vmem:[#allocation5 + $0xe8] sm:$0xff] }
  0x1c   :  { %188 = vmatpush.msra.mxu2 %v100_v22  ;;  %211 = vmatpush.msra.mxu3 %v101_v23  ;;  %v84_v38 = vld [vmem:[#allocation5 + $0xb0] sm:$0xff]  ;;  %v85_v39 = vld [vmem:[#allocation5 + $0xb8] sm:$0xff]  ;;  %v86_v40 = vld [vmem:[#allocation5 + $0xc0] sm:$0xff] }
  0x1d   :  { %164 = vmatpush.msra.mxu1 %v103_v25  ;;  %142 = vmatpush.msra.mxu0 %v98_v28  ;;  %v87_v41 = vld [vmem:[#allocation5 + $0xc8] sm:$0xff]  ;;  %v80_v42 = vld [vmem:[#allocation5 + $0x90] sm:$0xff]  ;;  %v81_v43 = vld [vmem:[#allocation5 + $0x98] sm:$0xff] }
  0x1e   :  { %189 = vmatpush.msra.mxu2 %v96_v26  ;;  %212 = vmatpush.msra.mxu3 %v97_v27  ;;  %v82_v44 = vld [vmem:[#allocation5 + $0xa0] sm:$0xff]  ;;  %v83_v45 = vld [vmem:[#allocation5 + $0xa8] sm:$0xff]  ;;  %v76_v46 = vld [vmem:[#allocation5 + $0x70] sm:$0xff] }
  0x1f   :  { %165 = vmatpush.msra.mxu1 %v99_v29  ;;  %143 = vmatpush.msra.mxu0 %v94_v32  ;;  %v77_v47 = vld [vmem:[#allocation5 + $0x78] sm:$0xff]  ;;  %v78_v48 = vld [vmem:[#allocation5 + $0x80] sm:$0xff]  ;;  %v79_v49 = vld [vmem:[#allocation5 + $0x88] sm:$0xff] }
  0x20   :  { %190 = vmatpush.msra.mxu2 %v92_v30  ;;  %213 = vmatpush.msra.mxu3 %v93_v31  ;;  %v72_v50 = vld [vmem:[#allocation5 + $0x50] sm:$0xff]  ;;  %v73_v51 = vld [vmem:[#allocation5 + $0x58] sm:$0xff]  ;;  %v74_v52 = vld [vmem:[#allocation5 + $0x60] sm:$0xff] }
  0x21   :  { %166 = vmatpush.msra.mxu1 %v95_v33  ;;  %144 = vmatpush.msra.mxu0 %v90_v36  ;;  %v75_v53 = vld [vmem:[#allocation5 + $0x68] sm:$0xff]  ;;  %v68_v54 = vld [vmem:[#allocation5 + $0x30] sm:$0xff]  ;;  %v69_v55 = vld [vmem:[#allocation5 + $0x38] sm:$0xff] }
  0x22   :  { %191 = vmatpush.msra.mxu2 %v88_v34  ;;  %214 = vmatpush.msra.mxu3 %v89_v35  ;;  %v70_v56 = vld [vmem:[#allocation5 + $0x40] sm:$0xff]  ;;  %v71_v57 = vld [vmem:[#allocation5 + $0x48] sm:$0xff]  ;;  %v64_v58 = vld [vmem:[#allocation5 + $0x10] sm:$0xff] }
  0x23   :  { %167 = vmatpush.msra.mxu1 %v91_v37  ;;  %145 = vmatpush.msra.mxu0 %v86_v40  ;;  %v65_v59 = vld [vmem:[#allocation5 + $0x18] sm:$0xff]  ;;  %v60_v60 = vld [vmem:[#allocation2] sm:$0xff]  ;;  %v66_v61 = vld [vmem:[#allocation5 + $0x20] sm:$0xff] }
  0x24   :  { %192 = vmatpush.msra.mxu2 %v84_v38  ;;  %215 = vmatpush.msra.mxu3 %v85_v39  ;;  %v67_v62 = vld [vmem:[#allocation5 + $0x28] sm:$0xff]  ;;  %v62_v63 = vld [vmem:[#allocation5] sm:$0xff]  ;;  %v61_v1 = vld [vmem:[#allocation2 + $0x8] sm:$0xff] }
  0x25   :  { %168 = vmatpush.msra.mxu1 %v87_v41  ;;  %146 = vmatpush.msra.mxu0 %v82_v44  ;;  %v63_v0 = vld [vmem:[#allocation5 + $0x8] sm:$0xff]  ;;  %v126_v2 = vld [vmem:[#allocation7] sm:$0xf] }
  0x26   :  { %193 = vmatpush.msra.mxu2 %v80_v42  ;;  %216 = vmatpush.msra.mxu3 %v81_v43  ;;  %v128_v3 = vperm.slane %v126_v2, 0  ;;  %v129_v4 = vperm.slane %v126_v2, 1  ;;  %v130_v5 = vperm.slane %v126_v2, 2  ;;  %v131_v6 = vperm.slane %v126_v2, 3 }
  0x27   :  { %169 = vmatpush.msra.mxu1 %v83_v45  ;;  %147 = vmatpush.msra.mxu0 %v78_v48 }
  0x28   :  { %194 = vmatpush.msra.mxu2 %v76_v46  ;;  %217 = vmatpush.msra.mxu3 %v77_v47 }
  0x29   :  { %170 = vmatpush.msra.mxu1 %v79_v49  ;;  %148 = vmatpush.msra.mxu0 %v74_v52 }
  0x2a   :  { %195 = vmatpush.msra.mxu2 %v72_v50  ;;  %218 = vmatpush.msra.mxu3 %v73_v51 }
  0x2b   :  { %171 = vmatpush.msra.mxu1 %v75_v53  ;;  %149 = vmatpush.msra.mxu0 %v70_v56 }
  0x2c   :  { %196 = vmatpush.msra.mxu2 %v68_v54  ;;  %219 = vmatpush.msra.mxu3 %v69_v55 }
  0x2d   :  { %172 = vmatpush.msra.mxu1 %v71_v57  ;;  %150 = vmatpush.msra.mxu0 %v66_v61 }
  0x2e   :  { %197 = vmatpush.msra.mxu2 %v64_v58  ;;  %220 = vmatpush.msra.mxu3 %v65_v59 }
  0x2f   :  { %198 = vmatmul.f32.vlgmr.msra.gmra.mxu2 %v60_v60  ;;  %221 = vmatmul.f32.vlgmr.msra.gmra.mxu3 %v60_v60 }
  0x30   :  { %173 = vmatpush.msra.mxu1 %v67_v62  ;;  %151 = vmatpush.msra.mxu0 %v62_v63 }
  0x31   :  { %152 = vmatmul.f32.vlgmr.msra.gmra.mxu0 %v60_v60 }
  0x32   :  { %174 = vmatpush.msra.mxu1 %v63_v0 }
  0x33   :  { %175 = vmatmul.f32.vlgmr.msra.gmra.mxu1 %v60_v60 }
  0x37   :  { %201 = vmatmul.f32.gmra.mxu2 %v61_v1  ;;  %224 = vmatmul.f32.gmra.mxu3 %v61_v1 }
  0x39   :  { %155 = vmatmul.f32.gmra.mxu0 %v61_v1 }
  0x3b   :  { %178 = vmatmul.f32.gmra.mxu1 %v61_v1 }
  0xae   :  { %v153_v7 = vpop.f32.mrf.mxu0 }
  0xaf   :  { %v154_v9 = vadd.f32 %v153_v7, %v128_v3 }
  0xb0   :  { %v176_v8 = vpop.f32.mrf.mxu1 }
  0xb1   :  { %v177_v10 = vadd.f32 %v176_v8, %v129_v4  ;;  %228 = vst [vmem:[#allocation8] sm:$0xff] %v154_v9 }
  0xb2   :  { %v199_v11 = vpop.f32.mrf.mxu2  ;;  %v222_v12 = vpop.f32.mrf.mxu3 }
  0xb3   :  { %v200_v13 = vadd.f32 %v199_v11, %v130_v5  ;;  %v223_v14 = vadd.f32 %v222_v12, %v131_v6  ;;  %229 = vst [vmem:[#allocation8 + $0x8] sm:$0xff] %v177_v10 }
  0xb5   :  { %230 = vst [vmem:[#allocation8 + $0x10] sm:$0xff] %v200_v13 }
  0xb6   :  { %231 = vst [vmem:[#allocation8 + $0x18] sm:$0xff] %v223_v14  ;;  %v156_v15 = vpop.f32.mrf.mxu0 }
  0xb7   :  { %v157_v17 = vadd.f32 %v156_v15, %v128_v3 }
  0xb8   :  { %v179_v16 = vpop.f32.mrf.mxu1 }
  0xb9   :  { %v180_v18 = vadd.f32 %v179_v16, %v129_v4  ;;  %232 = vst [vmem:[#allocation8 + $0x20] sm:$0xff] %v157_v17 }
  0xba   :  { %v202_v19 = vpop.f32.mrf.mxu2  ;;  %v225_v20 = vpop.f32.mrf.mxu3 }
  0xbb   :  { %v203_v21 = vadd.f32 %v202_v19, %v130_v5  ;;  %v226_v22 = vadd.f32 %v225_v20, %v131_v6  ;;  %233 = vst [vmem:[#allocation8 + $0x28] sm:$0xff] %v180_v18 }
  0xbd   :  { %234 = vst [vmem:[#allocation8 + $0x30] sm:$0xff] %v203_v21 }
  0xbe   :  { %235 = vst [vmem:[#allocation8 + $0x38] sm:$0xff] %v226_v22 }
  0xbf   :  { %248 = dma.vmem_to_hbm [thread:$0]  %s241_s29, 1024, %s243_s5, [#allocation4], %s367_s20, %s367_s20, %s368_s21  }
  0xc0   :  { %364 = dma.done.wait [#allocation4], 1024  }
  0xc1   :  { %365 = vsyncadd [#allocation4], 4294966272 }
  0xc2   :  { %253 = vsyncpa [#allocation3], 1 }
  0xc3   :  { %254 = vsyncpa [#allocation6], 1 }
  0xc4   :  { %255 = vsyncpa [#allocation4], 1 }

</bundles_post_ra>
